<compile_context>
chip_gen: v6e
topology: v6e:2x2x1
jax: 0.10.0
libtpu: 0.0.40
codegen_flags: <defaults>
</compile_context>

<pallas_src>
import functools

import jax
import jax.numpy as jnp
from jax import lax
from jax.experimental import pallas as pl
from jax.experimental.pallas import tpu as pltpu

IMQ_SCALES = (0.1, 0.2, 0.5, 1.0, 2.0, 5.0, 10.0)


# ----------------------------------------------------------------------------
# IMQ-kernel MMD statistic, computed on the stacked latents Z = [z_real; z_fake]
# via a single (2B, 2B) Gram matrix.  Matches ImqKernelLoss.forward (eye-masked)
# because the diagonal is removed with an explicit iota mask, not analytically.
# ----------------------------------------------------------------------------
def _imq_stats(Z, batch, h_dim):
    n2 = 2 * batch
    dn = (((1,), (1,)), ((), ()))                                  # contract features
    gram = lax.dot_general(Z, Z, dn, preferred_element_type=jnp.float32)  # (2B,2B)
    sq = jnp.sum(Z * Z, axis=1, keepdims=True)                     # (2B,1)
    dists = sq + sq.T - 2.0 * gram                                 # stacked distances

    row = lax.broadcasted_iota(jnp.int32, (n2, n2), 0)
    col = lax.broadcasted_iota(jnp.int32, (n2, n2), 1)
    in_x = (row < batch) & (col < batch)
    in_y = (row >= batch) & (col >= batch)
    same_offdiag = (in_x | in_y) & (row != col)    # off-diagonals of XX and YY blocks
    cross = (row < batch) & (col >= batch)         # the XY block (dists_c)

    stats = jnp.float32(0.0)
    for scale in IMQ_SCALES:                       # unrolled, 7 scales
        c = jnp.float32(2.0 * h_dim * 1.0 * scale)
        k = c * pl.reciprocal(c + dists, approx=False)   # EUP reciprocal, exact
        res1 = jnp.sum(jnp.where(same_offdiag, k, 0.0)) / (batch - 1)
        res2 = jnp.sum(jnp.where(cross, k, 0.0)) * 2.0 / batch
        stats = stats + (res1 - res2)
    return stats


# ----------------------------------------------------------------------------
# Fused kernel: streamed L2 reduction (grid axis 1) + MMD on the last step.
# ----------------------------------------------------------------------------
def _wae_fused_kernel(pred_ref, gt_ref, z_ref, out_ref, acc_ref, *,
                      batch, h_dim, mmd_weight, sublane_groups):
    p = pl.program_id(0)                 # core-split axis ("parallel")
    i = pl.program_id(1)                 # streamed reduction axis ("arbitrary")

    @pl.when(i == 0)
    def _():
        acc_ref[...] = jnp.zeros_like(acc_ref)

    d = pred_ref[...].astype(jnp.float32) - gt_ref[...].astype(jnp.float32)
    d2 = d * d
    # Reduce (block_rows, 128) -> (8, 128): vreg-aligned grouping, pure VPU adds.
    acc_ref[...] += jnp.sum(d2.reshape(sublane_groups, 8, 128), axis=0)

    @pl.when(i == pl.num_programs(1) - 1)
    def _():
        # Single cross-lane reduce per core + scale.
        recon_part = 0.05 * jnp.sum(acc_ref[...]) / batch
        # MMD on the tiny resident latent block; contributes only via p == 0.
        stats = _imq_stats(z_ref[...].astype(jnp.float32), batch, h_dim)
        total = recon_part + jnp.where(p == 0,
                                       jnp.float32(mmd_weight) * stats,
                                       jnp.float32(0.0))
        out_ref[...] = jnp.broadcast_to(total, out_ref.shape)   # lane-dense store


# ----------------------------------------------------------------------------
# Tiling plan for the (rows, 128) view (rows % 8 == 0).
# ----------------------------------------------------------------------------
def _plan_rows_tiling(rows, itemsize, target_block_bytes):
    # Aim for >= 4 row-blocks (2 per core after the 2-way split) so the DMA
    # pipeline has work to overlap, while keeping blocks near the byte target.
    target_rows = max(8, (target_block_bytes // (128 * itemsize)) // 8 * 8)
    quarter = (rows // 4) // 8 * 8 if rows >= 32 else rows
    cap = max(8, min(rows, target_rows, quarter))
    r8 = rows // 8
    block_rows = 8
    d = cap // 8
    while d >= 1:                         # largest multiple of 8 dividing rows, <= cap
        if r8 % d == 0:
            block_rows = 8 * d
            break
        d -= 1
    num_blocks = rows // block_rows
    if num_blocks % 2 == 0 and num_blocks >= 2:
        return block_rows, 2, num_blocks // 2      # 2-way core split
    return block_rows, 1, num_blocks


# ----------------------------------------------------------------------------
# WAETotalLoss forward
# ----------------------------------------------------------------------------
def wae_total_loss(pred_img, gt_img, embedding, latent_dims, sigma=1.0,
                   mmd_weight=1.0, *, rng_key, recon_block_bytes=2 << 20):
    b = gt_img.shape[0]
    assert b >= 2, "IMQ-MMD divides by (batch - 1); batch size must be >= 2"
    h_dim = int(latent_dims)

    # z_fake = randn(B, latent) * sigma, drawn in the wrapper so the draw is
    # reproducible/verifiable; stacked with z_real so the kernel needs only one
    # Gram matrix.  Tiny (2B, latent) array, not on the memory-bound path.
    z_fake = jax.random.normal(rng_key, (b, h_dim), jnp.float32) * sigma
    z_stack = jnp.concatenate([embedding.astype(jnp.float32), z_fake], axis=0)

    # Lane/sublane-dense view of the flattened images: (rows, 128), rows % 8 == 0.
    pred_flat = pred_img.reshape(-1)      # row-major reshape: metadata only
    gt_flat = gt_img.reshape(-1)
    n = pred_flat.shape[0]
    pad = (-n) % 1024                     # rare fallback; (0-0)^2 adds nothing
    if pad:
        pred_flat = jnp.pad(pred_flat, (0, pad))
        gt_flat = jnp.pad(gt_flat, (0, pad))
    rows = (n + pad) // 128
    pred2d = pred_flat.reshape(rows, 128)
    gt2d = gt_flat.reshape(rows, 128)

    itemsize = jnp.dtype(pred_img.dtype).itemsize
    block_rows, nsplit, inner = _plan_rows_tiling(rows, itemsize, recon_block_bytes)

    out = pl.pallas_call(
        functools.partial(_wae_fused_kernel, batch=b, h_dim=h_dim,
                          mmd_weight=float(mmd_weight),
                          sublane_groups=block_rows // 8),
        out_shape=jax.ShapeDtypeStruct((nsplit, 8, 128), jnp.float32),
        grid=(nsplit, inner),
        in_specs=[
            pl.BlockSpec((block_rows, 128), lambda p, i: (p * inner + i, 0)),
            pl.BlockSpec((block_rows, 128), lambda p, i: (p * inner + i, 0)),
            pl.BlockSpec(z_stack.shape, lambda p, i: (0, 0)),    # resident, tiny
        ],
        out_specs=pl.BlockSpec((1, 8, 128), lambda p, i: (p, 0, 0)),
        scratch_shapes=[pltpu.VMEM((8, 128), jnp.float32)],
        compiler_params=pltpu.CompilerParams(
            dimension_semantics=("parallel", "arbitrary"),
            vmem_limit_bytes=32 * 1024 * 1024,   # safe on v5e/v6e (128 MiB) and v7x (64 MiB)
        ),
    )(pred2d, gt2d, z_stack)

    # Each core-split writes its lane-dense block; combine the (<=2) partials.
    return jnp.sum(out[:, 0, 0])


# ----------------------------------------------------------------------------
# Pure-JAX reference (explicit eye mask), independent of the kernel.
# ----------------------------------------------------------------------------
def _reference(pred_img, gt_img, embedding, latent_dims, z_fake, mmd_weight=1.0):
    b = pred_img.shape[0]
    diff = (pred_img - gt_img).reshape(b, -1)
    recon = 0.05 * jnp.mean(jnp.sum(diff * diff, axis=1))

    X, Y = embedding, z_fake
    nx = jnp.sum(X * X, axis=1, keepdims=True)
    ny = jnp.sum(Y * Y, axis=1, keepdims=True)
    dx = nx + nx.T - 2 * X @ X.T
    dy = ny + ny.T - 2 * Y @ Y.T
    dc = nx + ny.T - 2 * X @ Y.T
    off = 1.0 - jnp.eye(b)
    stats = 0.0
    for s in IMQ_SCALES:
        C = 2 * latent_dims * 1.0 * s
        r1 = jnp.sum(off * (C / (C + dx) + C / (C + dy))) / (b - 1)
        r2 = jnp.sum(C / (C + dc)) * 2.0 / b
        stats += r1 - r2
    return recon + stats * mmd_weight


if __name__ == "__main__":
    key = jax.random.PRNGKey(0)
    k_pred, k_gt, k_emb, k_z = jax.random.split(key, 4)

    B, C, H, W = 2, 4, 32, 32
    latent_dims = 32

    pred_img = jax.random.normal(k_pred, (B, C, H, W), jnp.float32)
    gt_img = jax.random.normal(k_gt, (B, C, H, W), jnp.float32)
    embedding = jax.random.normal(k_emb, (B, latent_dims), jnp.float32)

    # Small recon_block_bytes so the toy shape exercises the full tiled path:
    # rows = 64 -> block_rows = 8, grid = (2, 4) (core split + 4-step carried
    # accumulation).  Real shapes use the 2 MiB per-input default.
    total = wae_total_loss(pred_img, gt_img, embedding, latent_dims,
                           sigma=1.0, mmd_weight=1.0, rng_key=k_z,
                           recon_block_bytes=4096)
    total = jax.block_until_ready(total)

    # Sanity check against the plain-JAX reference (same z_fake draw).
    z_fake = jax.random.normal(k_z, (B, latent_dims), jnp.float32) * 1.0
    ref = _reference(pred_img, gt_img, embedding, latent_dims, z_fake)
    assert jnp.allclose(total, ref, rtol=1e-4, atol=1e-4), (total, ref)

    print("KERNEL_OK")
</pallas_src>

<mosaic_0001>
module attributes {stable_mosaic.version = 11 : i64} {
  func.func @_wae_fused_kernel(%arg0: i32, %arg1: i32, %arg2: memref<8x128xf32, #tpu.memory_space<vmem>>, %arg3: memref<8x128xf32, #tpu.memory_space<vmem>>, %arg4: memref<4x32xf32, #tpu.memory_space<vmem>>, %arg5: memref<1x8x128xf32, #tpu.memory_space<vmem>>, %arg6: memref<8x128xf32, #tpu.memory_space<vmem>>) attributes {dimension_semantics = [#tpu.dimension_semantics<parallel>, #tpu.dimension_semantics<arbitrary>], iteration_bounds = array<i64: 2, 4>, scalar_prefetch = 0 : i64, scratch_operands = 1 : i64, tpu.core_type = #tpu.core_type<tc>, window_params = [{transform_indices = @transform_0, window_bounds = array<i64: 8, 128>}, {transform_indices = @transform_1, window_bounds = array<i64: 8, 128>}, {pipeline_mode = #tpu.pipeline_mode<synchronous>, transform_indices = @transform_2, window_bounds = array<i64: 4, 32>}, {transform_indices = @transform_3, window_bounds = array<i64: 1, 8, 128>}]} {
    %c0_i32 = arith.constant 0 : i32
    %0 = arith.cmpi eq, %arg1, %c0_i32 : i32
    %1 = arith.extui %0 : i1 to i32
    %c0_i32_0 = arith.constant 0 : i32
    %2 = arith.cmpi ne, %1, %c0_i32_0 : i32
    scf.if %2 {
      %cst_9 = arith.constant 0.000000e+00 : f32
      %15 = vector.broadcast %cst_9 : f32 to vector<8x128xf32>
      %c0_10 = arith.constant 0 : index
      %c0_11 = arith.constant 0 : index
      %16 = vector.load %arg6[%c0_10, %c0_11] : memref<8x128xf32, #tpu.memory_space<vmem>>, vector<8x128xf32>
      tpu.vector_store %arg6[%c0_10, %c0_11], %15 {strides = array<i32>} : memref<8x128xf32, #tpu.memory_space<vmem>>, vector<8x128xf32>,
    } else {
    }
    %c0 = arith.constant 0 : index
    %c0_1 = arith.constant 0 : index
    %3 = vector.load %arg2[%c0, %c0_1] : memref<8x128xf32, #tpu.memory_space<vmem>>, vector<8x128xf32>
    %c0_2 = arith.constant 0 : index
    %c0_3 = arith.constant 0 : index
    %4 = vector.load %arg3[%c0_2, %c0_3] : memref<8x128xf32, #tpu.memory_space<vmem>>, vector<8x128xf32>
    %5 = arith.subf %3, %4 : vector<8x128xf32>
    %6 = arith.mulf %5, %5 : vector<8x128xf32>
    %c0_4 = arith.constant 0 : index
    %c0_5 = arith.constant 0 : index
    %7 = vector.load %arg6[%c0_4, %c0_5] : memref<8x128xf32, #tpu.memory_space<vmem>>, vector<8x128xf32>
    %8 = vector.shape_cast %6 : vector<8x128xf32> to vector<1x8x128xf32>
    %cst = arith.constant dense<0.000000e+00> : vector<8x128xf32>
    %9 = vector.multi_reduction <add>, %8, %cst [0] : vector<1x8x128xf32> to vector<8x128xf32>
    %10 = arith.addf %7, %9 : vector<8x128xf32>
    %c0_6 = arith.constant 0 : index
    %c0_7 = arith.constant 0 : index
    %11 = vector.load %arg6[%c0_6, %c0_7] : memref<8x128xf32, #tpu.memory_space<vmem>>, vector<8x128xf32>
    tpu.vector_store %arg6[%c0_6, %c0_7], %10 {strides = array<i32>} : memref<8x128xf32, #tpu.memory_space<vmem>>, vector<8x128xf32>,
    %c3_i32 = arith.constant 3 : i32
    %12 = arith.cmpi eq, %arg1, %c3_i32 : i32
    %13 = arith.extui %12 : i1 to i32
    %c0_i32_8 = arith.constant 0 : i32
    %14 = arith.cmpi ne, %13, %c0_i32_8 : i32
    scf.if %14 {
      %c0_9 = arith.constant 0 : index
      %c0_10 = arith.constant 0 : index
      %15 = vector.load %arg6[%c0_9, %c0_10] : memref<8x128xf32, #tpu.memory_space<vmem>>, vector<8x128xf32>
      %16 = vector.shape_cast %15 : vector<8x128xf32> to vector<1x8x128xf32>
      %cst_11 = arith.constant dense<0.000000e+00> : vector<1xf32>
      %17 = vector.multi_reduction <add>, %16, %cst_11 [1, 2] : vector<1x8x128xf32> to vector<1xf32>
      %18 = vector.shape_cast %17 : vector<1xf32> to vector<1x1x1xf32>
      %19 = vector.extract %18[0, 0, 0] : f32 from vector<1x1x1xf32>
      %cst_12 = arith.constant 5.000000e-02 : f32
      %20 = arith.mulf %cst_12, %19 : f32
      %cst_13 = arith.constant 2.000000e+00 : f32
      %21 = arith.divf %20, %cst_13 : f32
      %c0_14 = arith.constant 0 : index
      %c0_15 = arith.constant 0 : index
      %22 = vector.load %arg4[%c0_14, %c0_15] : memref<4x32xf32, #tpu.memory_space<vmem>>, vector<4x32xf32>
      %cst_16 = arith.constant dense<0.000000e+00> : vector<4x4xf32>
      %23 = tpu.matmul %22, %22, %cst_16 {dimension_numbers = #tpu.dot_dimension_numbers<[1], [1], [0], [0], [0, 0, 1, 0], [], []>} : vector<4x32xf32>, vector<4x32xf32>, vector<4x4xf32> -> vector<4x4xf32>
      %24 = arith.mulf %22, %22 : vector<4x32xf32>
      %cst_17 = arith.constant dense<0.000000e+00> : vector<4xf32>
      %25 = vector.multi_reduction <add>, %24, %cst_17 [1] : vector<4x32xf32> to vector<4xf32>
      %26 = vector.shape_cast %25 : vector<4xf32> to vector<4x1xf32>
      %27 = tpu.transpose %26, [1, 0] : vector<4x1xf32> -> vector<1x4xf32>
      %28 = vector.broadcast %26 : vector<4x1xf32> to vector<4x4xf32>
      %29 = vector.broadcast %27 : vector<1x4xf32> to vector<4x4xf32>
      %30 = arith.addf %28, %29 : vector<4x4xf32>
      %cst_18 = arith.constant 2.000000e+00 : f32
      %31 = vector.broadcast %cst_18 : f32 to vector<4x4xf32>
      %32 = arith.mulf %31, %23 : vector<4x4xf32>
      %33 = arith.subf %30, %32 : vector<4x4xf32>
      %34 = tpu.iota {dimensions = array<i32: 0>} : vector<4x4xi32>
      %35 = tpu.iota {dimensions = array<i32: 1>} : vector<4x4xi32>
      %c2_i32 = arith.constant 2 : i32
      %36 = vector.broadcast %c2_i32 : i32 to vector<4x4xi32>
      %37 = arith.cmpi slt, %34, %36 : vector<4x4xi32>
      %c2_i32_19 = arith.constant 2 : i32
      %38 = vector.broadcast %c2_i32_19 : i32 to vector<4x4xi32>
      %39 = arith.cmpi slt, %35, %38 : vector<4x4xi32>
      %40 = arith.andi %37, %39 : vector<4x4xi1>
      %c2_i32_20 = arith.constant 2 : i32
      %41 = vector.broadcast %c2_i32_20 : i32 to vector<4x4xi32>
      %42 = arith.cmpi sge, %34, %41 : vector<4x4xi32>
      %c2_i32_21 = arith.constant 2 : i32
      %43 = vector.broadcast %c2_i32_21 : i32 to vector<4x4xi32>
      %44 = arith.cmpi sge, %35, %43 : vector<4x4xi32>
      %45 = arith.andi %42, %44 : vector<4x4xi1>
      %46 = arith.ori %40, %45 : vector<4x4xi1>
      %47 = arith.cmpi ne, %34, %35 : vector<4x4xi32>
      %48 = arith.andi %46, %47 : vector<4x4xi1>
      %c2_i32_22 = arith.constant 2 : i32
      %49 = vector.broadcast %c2_i32_22 : i32 to vector<4x4xi32>
      %50 = arith.cmpi slt, %34, %49 : vector<4x4xi32>
      %c2_i32_23 = arith.constant 2 : i32
      %51 = vector.broadcast %c2_i32_23 : i32 to vector<4x4xi32>
      %52 = arith.cmpi sge, %35, %51 : vector<4x4xi32>
      %53 = arith.andi %50, %52 : vector<4x4xi1>
      %cst_24 = arith.constant 6.400000e+00 : f32
      %54 = vector.broadcast %cst_24 : f32 to vector<4x4xf32>
      %55 = arith.addf %54, %33 : vector<4x4xf32>
      %56 = tpu.reciprocal %55 : vector<4x4xf32> -> vector<4x4xf32>
      %cst_25 = arith.constant 6.400000e+00 : f32
      %57 = vector.broadcast %cst_25 : f32 to vector<4x4xf32>
      %58 = arith.mulf %57, %56 : vector<4x4xf32>
      %cst_26 = arith.constant 0.000000e+00 : f32
      %59 = vector.broadcast %cst_26 : f32 to vector<4x4xf32>
      %60 = arith.select %48, %58, %59 : vector<4x4xi1>, vector<4x4xf32>
      %61 = vector.shape_cast %60 : vector<4x4xf32> to vector<1x4x4xf32>
      %cst_27 = arith.constant dense<0.000000e+00> : vector<1xf32>
      %62 = vector.multi_reduction <add>, %61, %cst_27 [1, 2] : vector<1x4x4xf32> to vector<1xf32>
      %63 = vector.shape_cast %62 : vector<1xf32> to vector<1x1x1xf32>
      %64 = vector.extract %63[0, 0, 0] : f32 from vector<1x1x1xf32>
      %cst_28 = arith.constant 1.000000e+00 : f32
      %65 = arith.divf %64, %cst_28 : f32
      %cst_29 = arith.constant 0.000000e+00 : f32
      %66 = vector.broadcast %cst_29 : f32 to vector<4x4xf32>
      %67 = arith.select %53, %58, %66 : vector<4x4xi1>, vector<4x4xf32>
      %68 = vector.shape_cast %67 : vector<4x4xf32> to vector<1x4x4xf32>
      %cst_30 = arith.constant dense<0.000000e+00> : vector<1xf32>
      %69 = vector.multi_reduction <add>, %68, %cst_30 [1, 2] : vector<1x4x4xf32> to vector<1xf32>
      %70 = vector.shape_cast %69 : vector<1xf32> to vector<1x1x1xf32>
      %71 = vector.extract %70[0, 0, 0] : f32 from vector<1x1x1xf32>
      %cst_31 = arith.constant 2.000000e+00 : f32
      %72 = arith.mulf %71, %cst_31 : f32
      %cst_32 = arith.constant 2.000000e+00 : f32
      %73 = arith.divf %72, %cst_32 : f32
      %74 = arith.subf %65, %73 : f32
      %cst_33 = arith.constant 0.000000e+00 : f32
      %75 = arith.addf %cst_33, %74 : f32
      %cst_34 = arith.constant 1.280000e+01 : f32
      %76 = vector.broadcast %cst_34 : f32 to vector<4x4xf32>
      %77 = arith.addf %76, %33 : vector<4x4xf32>
      %78 = tpu.reciprocal %77 : vector<4x4xf32> -> vector<4x4xf32>
      %cst_35 = arith.constant 1.280000e+01 : f32
      %79 = vector.broadcast %cst_35 : f32 to vector<4x4xf32>
      %80 = arith.mulf %79, %78 : vector<4x4xf32>
      %cst_36 = arith.constant 0.000000e+00 : f32
      %81 = vector.broadcast %cst_36 : f32 to vector<4x4xf32>
      %82 = arith.select %48, %80, %81 : vector<4x4xi1>, vector<4x4xf32>
      %83 = vector.shape_cast %82 : vector<4x4xf32> to vector<1x4x4xf32>
      %cst_37 = arith.constant dense<0.000000e+00> : vector<1xf32>
      %84 = vector.multi_reduction <add>, %83, %cst_37 [1, 2] : vector<1x4x4xf32> to vector<1xf32>
      %85 = vector.shape_cast %84 : vector<1xf32> to vector<1x1x1xf32>
      %86 = vector.extract %85[0, 0, 0] : f32 from vector<1x1x1xf32>
      %cst_38 = arith.constant 1.000000e+00 : f32
      %87 = arith.divf %86, %cst_38 : f32
      %cst_39 = arith.constant 0.000000e+00 : f32
      %88 = vector.broadcast %cst_39 : f32 to vector<4x4xf32>
      %89 = arith.select %53, %80, %88 : vector<4x4xi1>, vector<4x4xf32>
      %90 = vector.shape_cast %89 : vector<4x4xf32> to vector<1x4x4xf32>
      %cst_40 = arith.constant dense<0.000000e+00> : vector<1xf32>
      %91 = vector.multi_reduction <add>, %90, %cst_40 [1, 2] : vector<1x4x4xf32> to vector<1xf32>
      %92 = vector.shape_cast %91 : vector<1xf32> to vector<1x1x1xf32>
      %93 = vector.extract %92[0, 0, 0] : f32 from vector<1x1x1xf32>
      %cst_41 = arith.constant 2.000000e+00 : f32
      %94 = arith.mulf %93, %cst_41 : f32
      %cst_42 = arith.constant 2.000000e+00 : f32
      %95 = arith.divf %94, %cst_42 : f32
      %96 = arith.subf %87, %95 : f32
      %97 = arith.addf %75, %96 : f32
      %cst_43 = arith.constant 3.200000e+01 : f32
      %98 = vector.broadcast %cst_43 : f32 to vector<4x4xf32>
      %99 = arith.addf %98, %33 : vector<4x4xf32>
      %100 = tpu.reciprocal %99 : vector<4x4xf32> -> vector<4x4xf32>
      %cst_44 = arith.constant 3.200000e+01 : f32
      %101 = vector.broadcast %cst_44 : f32 to vector<4x4xf32>
      %102 = arith.mulf %101, %100 : vector<4x4xf32>
      %cst_45 = arith.constant 0.000000e+00 : f32
      %103 = vector.broadcast %cst_45 : f32 to vector<4x4xf32>
      %104 = arith.select %48, %102, %103 : vector<4x4xi1>, vector<4x4xf32>
      %105 = vector.shape_cast %104 : vector<4x4xf32> to vector<1x4x4xf32>
      %cst_46 = arith.constant dense<0.000000e+00> : vector<1xf32>
      %106 = vector.multi_reduction <add>, %105, %cst_46 [1, 2] : vector<1x4x4xf32> to vector<1xf32>
      %107 = vector.shape_cast %106 : vector<1xf32> to vector<1x1x1xf32>
      %108 = vector.extract %107[0, 0, 0] : f32 from vector<1x1x1xf32>
      %cst_47 = arith.constant 1.000000e+00 : f32
      %109 = arith.divf %108, %cst_47 : f32
      %cst_48 = arith.constant 0.000000e+00 : f32
      %110 = vector.broadcast %cst_48 : f32 to vector<4x4xf32>
      %111 = arith.select %53, %102, %110 : vector<4x4xi1>, vector<4x4xf32>
      %112 = vector.shape_cast %111 : vector<4x4xf32> to vector<1x4x4xf32>
      %cst_49 = arith.constant dense<0.000000e+00> : vector<1xf32>
      %113 = vector.multi_reduction <add>, %112, %cst_49 [1, 2] : vector<1x4x4xf32> to vector<1xf32>
      %114 = vector.shape_cast %113 : vector<1xf32> to vector<1x1x1xf32>
      %115 = vector.extract %114[0, 0, 0] : f32 from vector<1x1x1xf32>
      %cst_50 = arith.constant 2.000000e+00 : f32
      %116 = arith.mulf %115, %cst_50 : f32
      %cst_51 = arith.constant 2.000000e+00 : f32
      %117 = arith.divf %116, %cst_51 : f32
      %118 = arith.subf %109, %117 : f32
      %119 = arith.addf %97, %118 : f32
      %cst_52 = arith.constant 6.400000e+01 : f32
      %120 = vector.broadcast %cst_52 : f32 to vector<4x4xf32>
      %121 = arith.addf %120, %33 : vector<4x4xf32>
      %122 = tpu.reciprocal %121 : vector<4x4xf32> -> vector<4x4xf32>
      %cst_53 = arith.constant 6.400000e+01 : f32
      %123 = vector.broadcast %cst_53 : f32 to vector<4x4xf32>
      %124 = arith.mulf %123, %122 : vector<4x4xf32>
      %cst_54 = arith.constant 0.000000e+00 : f32
      %125 = vector.broadcast %cst_54 : f32 to vector<4x4xf32>
      %126 = arith.select %48, %124, %125 : vector<4x4xi1>, vector<4x4xf32>
      %127 = vector.shape_cast %126 : vector<4x4xf32> to vector<1x4x4xf32>
      %cst_55 = arith.constant dense<0.000000e+00> : vector<1xf32>
      %128 = vector.multi_reduction <add>, %127, %cst_55 [1, 2] : vector<1x4x4xf32> to vector<1xf32>
      %129 = vector.shape_cast %128 : vector<1xf32> to vector<1x1x1xf32>
      %130 = vector.extract %129[0, 0, 0] : f32 from vector<1x1x1xf32>
      %cst_56 = arith.constant 1.000000e+00 : f32
      %131 = arith.divf %130, %cst_56 : f32
      %cst_57 = arith.constant 0.000000e+00 : f32
      %132 = vector.broadcast %cst_57 : f32 to vector<4x4xf32>
      %133 = arith.select %53, %124, %132 : vector<4x4xi1>, vector<4x4xf32>
      %134 = vector.shape_cast %133 : vector<4x4xf32> to vector<1x4x4xf32>
      %cst_58 = arith.constant dense<0.000000e+00> : vector<1xf32>
      %135 = vector.multi_reduction <add>, %134, %cst_58 [1, 2] : vector<1x4x4xf32> to vector<1xf32>
      %136 = vector.shape_cast %135 : vector<1xf32> to vector<1x1x1xf32>
      %137 = vector.extract %136[0, 0, 0] : f32 from vector<1x1x1xf32>
      %cst_59 = arith.constant 2.000000e+00 : f32
      %138 = arith.mulf %137, %cst_59 : f32
      %cst_60 = arith.constant 2.000000e+00 : f32
      %139 = arith.divf %138, %cst_60 : f32
      %140 = arith.subf %131, %139 : f32
      %141 = arith.addf %119, %140 : f32
      %cst_61 = arith.constant 1.280000e+02 : f32
      %142 = vector.broadcast %cst_61 : f32 to vector<4x4xf32>
      %143 = arith.addf %142, %33 : vector<4x4xf32>
      %144 = tpu.reciprocal %143 : vector<4x4xf32> -> vector<4x4xf32>
      %cst_62 = arith.constant 1.280000e+02 : f32
      %145 = vector.broadcast %cst_62 : f32 to vector<4x4xf32>
      %146 = arith.mulf %145, %144 : vector<4x4xf32>
      %cst_63 = arith.constant 0.000000e+00 : f32
      %147 = vector.broadcast %cst_63 : f32 to vector<4x4xf32>
      %148 = arith.select %48, %146, %147 : vector<4x4xi1>, vector<4x4xf32>
      %149 = vector.shape_cast %148 : vector<4x4xf32> to vector<1x4x4xf32>
      %cst_64 = arith.constant dense<0.000000e+00> : vector<1xf32>
      %150 = vector.multi_reduction <add>, %149, %cst_64 [1, 2] : vector<1x4x4xf32> to vector<1xf32>
      %151 = vector.shape_cast %150 : vector<1xf32> to vector<1x1x1xf32>
      %152 = vector.extract %151[0, 0, 0] : f32 from vector<1x1x1xf32>
      %cst_65 = arith.constant 1.000000e+00 : f32
      %153 = arith.divf %152, %cst_65 : f32
      %cst_66 = arith.constant 0.000000e+00 : f32
      %154 = vector.broadcast %cst_66 : f32 to vector<4x4xf32>
      %155 = arith.select %53, %146, %154 : vector<4x4xi1>, vector<4x4xf32>
      %156 = vector.shape_cast %155 : vector<4x4xf32> to vector<1x4x4xf32>
      %cst_67 = arith.constant dense<0.000000e+00> : vector<1xf32>
      %157 = vector.multi_reduction <add>, %156, %cst_67 [1, 2] : vector<1x4x4xf32> to vector<1xf32>
      %158 = vector.shape_cast %157 : vector<1xf32> to vector<1x1x1xf32>
      %159 = vector.extract %158[0, 0, 0] : f32 from vector<1x1x1xf32>
      %cst_68 = arith.constant 2.000000e+00 : f32
      %160 = arith.mulf %159, %cst_68 : f32
      %cst_69 = arith.constant 2.000000e+00 : f32
      %161 = arith.divf %160, %cst_69 : f32
      %162 = arith.subf %153, %161 : f32
      %163 = arith.addf %141, %162 : f32
      %cst_70 = arith.constant 3.200000e+02 : f32
      %164 = vector.broadcast %cst_70 : f32 to vector<4x4xf32>
      %165 = arith.addf %164, %33 : vector<4x4xf32>
      %166 = tpu.reciprocal %165 : vector<4x4xf32> -> vector<4x4xf32>
      %cst_71 = arith.constant 3.200000e+02 : f32
      %167 = vector.broadcast %cst_71 : f32 to vector<4x4xf32>
      %168 = arith.mulf %167, %166 : vector<4x4xf32>
      %cst_72 = arith.constant 0.000000e+00 : f32
      %169 = vector.broadcast %cst_72 : f32 to vector<4x4xf32>
      %170 = arith.select %48, %168, %169 : vector<4x4xi1>, vector<4x4xf32>
      %171 = vector.shape_cast %170 : vector<4x4xf32> to vector<1x4x4xf32>
      %cst_73 = arith.constant dense<0.000000e+00> : vector<1xf32>
      %172 = vector.multi_reduction <add>, %171, %cst_73 [1, 2] : vector<1x4x4xf32> to vector<1xf32>
      %173 = vector.shape_cast %172 : vector<1xf32> to vector<1x1x1xf32>
      %174 = vector.extract %173[0, 0, 0] : f32 from vector<1x1x1xf32>
      %cst_74 = arith.constant 1.000000e+00 : f32
      %175 = arith.divf %174, %cst_74 : f32
      %cst_75 = arith.constant 0.000000e+00 : f32
      %176 = vector.broadcast %cst_75 : f32 to vector<4x4xf32>
      %177 = arith.select %53, %168, %176 : vector<4x4xi1>, vector<4x4xf32>
      %178 = vector.shape_cast %177 : vector<4x4xf32> to vector<1x4x4xf32>
      %cst_76 = arith.constant dense<0.000000e+00> : vector<1xf32>
      %179 = vector.multi_reduction <add>, %178, %cst_76 [1, 2] : vector<1x4x4xf32> to vector<1xf32>
      %180 = vector.shape_cast %179 : vector<1xf32> to vector<1x1x1xf32>
      %181 = vector.extract %180[0, 0, 0] : f32 from vector<1x1x1xf32>
      %cst_77 = arith.constant 2.000000e+00 : f32
      %182 = arith.mulf %181, %cst_77 : f32
      %cst_78 = arith.constant 2.000000e+00 : f32
      %183 = arith.divf %182, %cst_78 : f32
      %184 = arith.subf %175, %183 : f32
      %185 = arith.addf %163, %184 : f32
      %cst_79 = arith.constant 6.400000e+02 : f32
      %186 = vector.broadcast %cst_79 : f32 to vector<4x4xf32>
      %187 = arith.addf %186, %33 : vector<4x4xf32>
      %188 = tpu.reciprocal %187 : vector<4x4xf32> -> vector<4x4xf32>
      %cst_80 = arith.constant 6.400000e+02 : f32
      %189 = vector.broadcast %cst_80 : f32 to vector<4x4xf32>
      %190 = arith.mulf %189, %188 : vector<4x4xf32>
      %cst_81 = arith.constant 0.000000e+00 : f32
      %191 = vector.broadcast %cst_81 : f32 to vector<4x4xf32>
      %192 = arith.select %48, %190, %191 : vector<4x4xi1>, vector<4x4xf32>
      %193 = vector.shape_cast %192 : vector<4x4xf32> to vector<1x4x4xf32>
      %cst_82 = arith.constant dense<0.000000e+00> : vector<1xf32>
      %194 = vector.multi_reduction <add>, %193, %cst_82 [1, 2] : vector<1x4x4xf32> to vector<1xf32>
      %195 = vector.shape_cast %194 : vector<1xf32> to vector<1x1x1xf32>
      %196 = vector.extract %195[0, 0, 0] : f32 from vector<1x1x1xf32>
      %cst_83 = arith.constant 1.000000e+00 : f32
      %197 = arith.divf %196, %cst_83 : f32
      %cst_84 = arith.constant 0.000000e+00 : f32
      %198 = vector.broadcast %cst_84 : f32 to vector<4x4xf32>
      %199 = arith.select %53, %190, %198 : vector<4x4xi1>, vector<4x4xf32>
      %200 = vector.shape_cast %199 : vector<4x4xf32> to vector<1x4x4xf32>
      %cst_85 = arith.constant dense<0.000000e+00> : vector<1xf32>
      %201 = vector.multi_reduction <add>, %200, %cst_85 [1, 2] : vector<1x4x4xf32> to vector<1xf32>
      %202 = vector.shape_cast %201 : vector<1xf32> to vector<1x1x1xf32>
      %203 = vector.extract %202[0, 0, 0] : f32 from vector<1x1x1xf32>
      %cst_86 = arith.constant 2.000000e+00 : f32
      %204 = arith.mulf %203, %cst_86 : f32
      %cst_87 = arith.constant 2.000000e+00 : f32
      %205 = arith.divf %204, %cst_87 : f32
      %206 = arith.subf %197, %205 : f32
      %207 = arith.addf %185, %206 : f32
      %c0_i32_88 = arith.constant 0 : i32
      %208 = arith.cmpi eq, %arg0, %c0_i32_88 : i32
      %cst_89 = arith.constant 1.000000e+00 : f32
      %209 = arith.mulf %cst_89, %207 : f32
      %cst_90 = arith.constant 0.000000e+00 : f32
      %210 = arith.select %208, %209, %cst_90 : f32
      %211 = arith.addf %21, %210 : f32
      %212 = vector.broadcast %211 : f32 to vector<1x8x128xf32>
      %c0_91 = arith.constant 0 : index
      %c0_92 = arith.constant 0 : index
      %c0_93 = arith.constant 0 : index
      %213 = vector.load %arg5[%c0_91, %c0_92, %c0_93] : memref<1x8x128xf32, #tpu.memory_space<vmem>>, vector<1x8x128xf32>
      tpu.vector_store %arg5[%c0_91, %c0_92, %c0_93], %212 {strides = array<i32>} : memref<1x8x128xf32, #tpu.memory_space<vmem>>, vector<1x8x128xf32>,
    } else {
    }
    return
  }
  func.func @transform_0(%arg0: i32, %arg1: i32) -> (i32, i32) {
    %c4_i32 = arith.constant 4 : i32
    %0 = arith.muli %arg0, %c4_i32 : i32
    %1 = arith.addi %0, %arg1 : i32
    %c0_i32 = arith.constant 0 : i32
    %c0_i32_0 = arith.constant 0 : i32
    return %1, %c0_i32 : i32, i32
  }
  func.func @transform_1(%arg0: i32, %arg1: i32) -> (i32, i32) {
    %c4_i32 = arith.constant 4 : i32
    %0 = arith.muli %arg0, %c4_i32 : i32
    %1 = arith.addi %0, %arg1 : i32
    %c0_i32 = arith.constant 0 : i32
    %c0_i32_0 = arith.constant 0 : i32
    return %1, %c0_i32 : i32, i32
  }
  func.func @transform_2(%arg0: i32, %arg1: i32) -> (i32, i32) {
    %c0_i32 = arith.constant 0 : i32
    %c0_i32_0 = arith.constant 0 : i32
    %c0_i32_1 = arith.constant 0 : i32
    return %c0_i32, %c0_i32_0 : i32, i32
  }
  func.func @transform_3(%arg0: i32, %arg1: i32) -> (i32, i32, i32) {
    %c0_i32 = arith.constant 0 : i32
    %c0_i32_0 = arith.constant 0 : i32
    %c0_i32_1 = arith.constant 0 : i32
    return %arg0, %c0_i32, %c0_i32_0 : i32, i32, i32
  }
}

</mosaic_0001>

<bundles_post_ra>
// kernel: tpu_custom_call.1
= control target key start
LH: loop header
LB: loop body
LE: loop exit
PB: predicated region body
PF: predicated region fallthrough
CT: control target
= control target key end

     0   :  { %s1522_s0 = inlined_call_operand.hbm [shape: f32[64,128], index: 0, kind: input, shape index: {}]   ;;  %s1523_s1 = inlined_call_operand.hbm [shape: f32[64,128], index: 1, kind: input, shape index: {}]   ;;  %s1524_s2 = inlined_call_operand.hbm [shape: f32[4,32], index: 2, kind: input, shape index: {}]   ;;  %s1525_s3 = inlined_call_operand.hbm [shape: f32[2,8,128], index: 3, kind: output, shape index: {}]  }
   0x1   :  { %1541 = sst [smem:[#allocation29_spill]] %s1522_s0 }
   0x2   :  { %1542 = sst [smem:[#allocation30_spill]] %s1523_s1 }
   0x3   :  { %1543 = sst [smem:[#allocation31_spill]] %s1524_s2 }
   0x4   :  { %1544 = sst [smem:[#allocation32_spill]] %s1525_s3 }
   0x5   :  { %8 = vsyncpa [#allocation4], 0 }
   0x6   :  { %10 = vsyncpa [#allocation4 + $0x1], 0 }
   0x7   :  { %11 = vsyncpa [#allocation7], 0 }
   0x8   :  { %13 = vsyncpa [#allocation7 + $0x1], 0 }
   0x9   :  { %14 = vsyncpa [#allocation5], 0 }
   0xa   :  { %16 = vsyncpa [#allocation5 + $0x1], 0  ;;  %s1220_s12 = smov 0   ;;  %s1222_s13 = smov 0  }
   0xb   :  { %s1224_s14 = smov 0   ;;  %s1226_s15 = smov 0  }
   0xc   :  { %s1228_s16 = smov 0   ;;  %s1230_s17 = smov 0  }
   0xd   :  { %s1232_s18 = smov 0   ;;  %s1234_s19 = smov 0  }
   0xe   :  { %s1236_s20 = smov 0   ;;  %s1238_s21 = smov 0  }
   0xf   :  { %s1240_s22 = smov 0  }
  0x10 LB: > { %1545 = sst [smem:[#allocation14_spill]] %s1151_s12  ;;  %s1274_s23 = sadd.s32 4294967295, %s1191_s22   ;;  %s1191_s22 = sphi %s1240_s22, %s22_s22   ;;  %s1187_s21 = sphi %s1238_s21, %s1594_s21   ;;  %s1183_s20 = sphi %s1236_s20, %s1593_s20   ;;  %s1179_s19 = sphi %s1234_s19, %s1592_s19   ;;  %s1175_s18 = sphi %s1232_s18, %s1591_s18   ;;  %s1171_s17 = sphi %s1230_s17, %s1590_s17   ;;  %s1167_s16 = sphi %s1228_s16, %s1589_s16   ;;  %s1163_s15 = sphi %s1226_s15, %s1588_s15   ;;  %s1159_s14 = sphi %s1224_s14, %s1587_s14   ;;  %s1155_s13 = sphi %s1222_s13, %s1596_s13   ;;  %s1151_s12 = sphi %s1220_s12, %s1595_s12  }
  0x11   : > { %1546 = sst [smem:[#allocation15_spill]] %s1159_s14  ;;  %s782_s24 = sadd.s32 4294967294, %s1191_s22  }
  0x12   : > { %1547 = sst [smem:[#allocation16_spill]] %s1167_s16  ;;  %p58_p0 = scmp.ne.s32.totalorder %s1167_s16, %s1163_s15 }
  0x13   : > { %1548 = sst [smem:[#allocation17_spill]] %s1171_s17  ;;  %p59_p1 = scmp.eq.s32.totalorder %s1274_s23, 0 }
  0x14   : > { %1549 = sst [smem:[#allocation18_spill]] %s1175_s18  ;;  %s122_s25 = sadd.s32 1, %s1159_s14 }
  0x15   : > { %1550 = sst [smem:[#allocation19_spill]] %s1179_s19  ;;  %p132_p2 = scmp.ne.s32.totalorder %s1159_s14, %s1155_s13 }
  0x16   : > { %1551 = sst [smem:[#allocation20_spill]] %s1183_s20  ;;  %p1284_p3 = por %p59_p1, %p58_p0 }
  0x17   : > { %1552 = sst [smem:[#allocation21_spill]] %s1187_s21  ;;  %p133_p4 = scmp.eq.s32.totalorder %s1274_s23, 7 }
  0x18   : > { %1553 = sst [smem:[#allocation22_spill]] %s1191_s22  ;;  %p138_p5 = scmp.ne.s32.totalorder %s1155_s13, %s1151_s12 }
  0x19   : > { %p139_p6 = scmp.eq.s32.totalorder %s782_s24, 7  ;;  %p1291_p7 = por %p133_p4, %p132_p2 }
  0x1a   : > { %p787_p8 = scmp.ge.s32.totalorder %s1191_s22, 1  ;;  %p146_p10 = scmp.lt.s32.totalorder %s1191_s22, 9 }
  0x1b   : > { %s1555_s27 = scalar_select %p1291_p7, 1, 0 }
  0x1c   : > { %p1296_p9 = por %p139_p6, %p138_p5  ;;  %p1301_p11 = pnand %p787_p8, %p146_p10 }
  0x1d   : > { %1556 = sst [smem:[#allocation23_spill]] %s1555_s27  ;;  %s1193_s30 = smov [#allocation8]  }
  0x1e   : > { %s1557_s28 = scalar_select %p1296_p9, 1, 0 }
  0x1f   : > { %s159_s4 = sshll.u32 %s1193_s30, 4  ;;  %p856_p12 = pneg %p1301_p11  ;;  %s160_s4 = int_to_ptr.vmem [resolvable:$true] %s159_s4 }
  0x20   : > { %1558 = sst [smem:[#allocation24_spill]] %s1557_s28  ;;  %s31_s5 = sadd.s32 1, %s1183_s20 }
  0x21   : > { %p857_p13 = pnand %p856_p12, %p59_p1  ;;  %s992_s6 = scalar_lea.vmem %s160_s4, 64 }
  0x22   : > { %p993_p2 = scmp.ne.s32.totalorder %s160_s4, %s992_s6  ;;  %p1000_p6 = scmp.lt.s32.totalorder %s160_s4, %s160_s4 }
  0x23   : > { %p983_p0 = pneg %p857_p13  ;;  %p1001_p9 = scmp.lt.s32.totalorder %s992_s6, %s992_s6 }
  0x25   : > { %p995_p4 = pnand %p993_p2, %p983_p0  ;;  %p1002_p8 = por %p1001_p9, %p1000_p6 }
  0x27   : > { %p996_p5 = pneg %p995_p4 }
  0x29   : > { %p1003_p10 = pnand %p1002_p8, %p996_p5 }
  0x2b   : > { %1006 = shalt.err (!%p1003_p10)
}
  0x2c   : > { %s1560_s2 = sld [smem:[#allocation31_spill]]  ;;  %p32_p12 = scmp.ge.s32.totalorder %s31_s5, 4 }
  0x2d   : > { %s34_s9 = sadd.s32 1, %s1187_s21  ;;  %s783_s10 = sshll.u32 %s1187_s21, 2 }
  0x2e   : > { %s45_s11 = sadd.s32 1, %s1171_s17  ;;  %s1598_s5 = smov (%p32_p12, %s31_s5), 0 }
  0x2f   : > { %1561 = sst [smem:[#allocation25_spill]] %s1598_s5  ;;  %s1600_s9 = smov (!%p32_p12, %s34_s9), %s1187_s21 }
  0x30   : > { %s39_s15 = sadd.s32 %s1183_s20, %s783_s10  ;;  %p52_p9 = scmp.ne.s32.totalorder %s1171_s17, %s1167_s16 }
  0x31   : > { %p36_p0 = scmp.ge.s32.totalorder %s1600_s9, 2  ;;  %p53_p2 = scmp.eq.s32.totalorder %s1191_s22, 0 }
  0x32   : > { %859 = dma.hbm_to_vmem [thread:$0]  (!%p857_p13), %s1560_s2, 64, %s160_s4, [#allocation7]  }
  0x33   : > { %p872_p4 = scmp.lt.s32.totalorder %s1191_s22, 8  ;;  %s170_s24 = sand.u32 1, %s1171_s17  }
  0x34   : > { %s1602_s9 = smov (%p36_p0, %s1600_s9), 0  ;;  %p1327_p13 = por %p53_p2, %p52_p9 }
  0x35   : > { %1562 = sst [smem:[#allocation26_spill]] %s1602_s9  ;;  %s784_s4 = sshll.u32 %s1602_s9, 2 }
  0x36   : > { %s119_s6 = ssub.s32 %s1187_s21, %s1602_s9  ;;  %s41_s7 = sadd.s32 %s784_s4, %s1598_s5 }
  0x37   : > { %p120_p5 = scmp.eq.s32.totalorder %s119_s6, 0  ;;  %s42_s8 = ssub.s32 %s39_s15, %s41_s7 }
  0x38   : > { %s1335_s10 = sshll.u32 %s170_s24, 3  ;;  %p43_p6 = scmp.eq.s32.totalorder %s42_s8, 0 }
  0x39   : > { %s1340_s2 = scalar_select %p120_p5, %s1159_s14, %s122_s25  }
  0x3a   : > { %s1343_s20 = scalar_select %p43_p6, %s1171_s17, %s45_s11  }
  0x3b   : > { %1564 = sst [smem:[#allocation27_spill]] %s1340_s2  ;;  %s792_s28 = sshll.u32 %s39_s15, 7 }
  0x3c   : > { %1565 = sst [smem:[#allocation28_spill]] %s1343_s20  ;;  %s174_s12 = scalar_lea.vmem [#allocation3], %s1335_s10 }
  0x3d   : > { %s183_s3 = sshll.u32 %s174_s12, 4  ;;  %s1566_s0 = sld [smem:[#allocation29_spill]]  ;;  %s184_s3 = int_to_ptr.vmem [resolvable:$true] %s183_s3 }
  0x3e   : > { %p1353_p8 = pnand %p872_p4, %p1327_p13  ;;  %s1568_s1 = sld [smem:[#allocation30_spill]] }
  0x3f   : > { %s190_s11 = sand.u32 1, %s1191_s22   ;;  %s171_s12 = scalar_lea.sflag [#allocation4], %s170_s24 }
  0x40   : > { %p1009_p10 = pneg %p1353_p8  ;;  %s1020_s19 = scalar_lea.vmem %s184_s3, 128 }
  0x41   : > { %p1021_p12 = scmp.ne.s32.totalorder %s184_s3, %s1020_s19  ;;  %s1194_s27 = smov [#allocation3]  }
  0x42   : > { %s1025_s15 = sshll.u32 %s1194_s27, 4  ;;  %s1026_s15 = int_to_ptr.vmem [resolvable:$false] %s1025_s15 }
  0x43   : > { %s181_s18 = scalar_lea.hbm %s1566_s0, %s792_s28  ;;  %p1023_p9 = pnand %p1021_p12, %p1009_p10 }
  0x44   : > { %s1360_s25 = scalar_lea.hbm %s1568_s1, %s792_s28  ;;  %s1027_s30 = scalar_lea.vmem %s1026_s15, 256 }
  0x45   : > { %p1024_p0 = pneg %p1023_p9  ;;  %p1028_p2 = scmp.lt.s32.totalorder %s184_s3, %s1026_s15 }
  0x46   : > { %p1029_p4 = scmp.lt.s32.totalorder %s1027_s30, %s1020_s19 }
  0x48   : > { %p1030_p13 = por %p1029_p4, %p1028_p2 }
  0x4a   : > { %p1031_p5 = pnand %p1030_p13, %p1024_p0 }
  0x4c   : > { %1034 = shalt.err (!%p1031_p5)
}
  0x4d   : > { %863 = dma.hbm_to_vmem [thread:$0]  (!%p1353_p8), %s181_s18, 128, %s184_s3, %s171_s12  }
  0x4e   : > { %s194_s28 = scalar_lea.vmem [#allocation6], %s1335_s10  ;;  %s191_s8 = scalar_lea.sflag [#allocation7], %s190_s11 }
  0x4f   : > { %s203_s24 = sshll.u32 %s194_s28, 4  ;;  %s1195_s7 = smov [#allocation6]   ;;  %s204_s24 = int_to_ptr.vmem [resolvable:$true] %s203_s24 }
  0x50   : > { %s1048_s6 = scalar_lea.vmem %s204_s24, 128  ;;  %s1053_s19 = sshll.u32 %s1195_s7, 4  ;;  %s1054_s19 = int_to_ptr.vmem [resolvable:$false] %s1053_s19 }
  0x51   : > { %p1049_p6 = scmp.ne.s32.totalorder %s204_s24, %s1048_s6  ;;  %s1055_s27 = scalar_lea.vmem %s1054_s19, 256 }
  0x52   : > { %p1056_p0 = scmp.lt.s32.totalorder %s204_s24, %s1054_s19  ;;  %p1057_p2 = scmp.lt.s32.totalorder %s1055_s27, %s1048_s6 }
  0x53   : > { %p1051_p12 = pnand %p1049_p6, %p1009_p10 }
  0x54   : > { %p1058_p4 = por %p1057_p2, %p1056_p0 }
  0x55   : > { %p1052_p9 = pneg %p1051_p12 }
  0x57   : > { %p1059_p13 = pnand %p1058_p4, %p1052_p9 }
  0x59   : > { %1062 = shalt.err (!%p1059_p13)
}
  0x5a   : > { %866 = dma.hbm_to_vmem [thread:$0]  (!%p1353_p8), %s1360_s25, 128, %s204_s24, %s191_s8  }
  0x5b   : > { %212 = sbr.rel (%p1301_p11) target bundleno = 711 (0x2c7), region = 32  ;;  %s214_s3 = sand.u32 (!%p1301_p11), 1, %s1167_s16  }
  0x5c   : > { %s797_s18 = sshll.u32 (!%p1301_p11), %s214_s3, 3  ;;  %s215_s10 = scalar_lea.sflag (!%p1301_p11), [#allocation4], %s214_s3 }
  0x5d   : > { %s218_s11 = scalar_lea.vmem (!%p1301_p11), [#allocation3], %s797_s18 }
  0x60   : > { %1134 = dma.done.wait (%p1284_p3), %s215_s10, 128  }
  0x61   : > { %1136 = vsyncadd (%p1284_p3), %s215_s10, 4294967168  ;;  %s223_s12 = sand.u32 1, %s1274_s23   ;;  %s227_s15 = scalar_lea.vmem [#allocation6], %s797_s18 }
  0x62   : > { %s224_s4 = scalar_lea.sflag [#allocation7], %s223_s12 }
  0x63   : > { %1138 = dma.done.wait (%p1284_p3), %s224_s4, 128  }
  0x64   : > { %1140 = vsyncadd (%p1284_p3), %s224_s4, 4294967168 }
  0x65   : > { %1142 = dma.done.wait (%p59_p1), [#allocation7], 64  }
  0x66   : > { %1144 = vsyncadd (%p59_p1), [#allocation7], 4294967232  ;;  %s1532_s29 = sand.u32 1, %s1155_s13   ;;  %s1569_s28 = sld [smem:[#allocation18_spill]] }
  0x67   : > { %s1396_s25 = sshll.u32 %s1532_s29, 3 }
  0x6c   : > { %p801_p11 = scmp.ne.s32.totalorder %s1569_s28, 0 }
  0x6e   : > { %266 = sbr.rel (%p801_p11) target bundleno = 117 (0x75), region = 48 }
  0x73   : > { %v1196_v0 = vmov 0.0  }
  0x74   : > { %267 = vst [vmem:[#allocation2] sm:$0xff] %v1196_v0 }
  0x75 PF: > { %v268_v1 = vld [vmem:[%s218_s11] sm:$0xff]  ;;  %v269_v2 = vld [vmem:[%s227_s15] sm:$0xff]  ;;  %s1570_s23 = sld [smem:[#allocation18_spill]] }
  0x76   : > { %v270_v3 = vsub.f32 %v268_v1, %v269_v2 }
  0x78   : > { %v271_v5 = vmul.f32 %v270_v3, %v270_v3 }
  0x7b   : > { %v272_v4 = vld [vmem:[#allocation2] sm:$0xff]  ;;  %p802_p1 = scmp.ne.s32.totalorder %s1570_s23, 3 }
  0x7c   : > { %v274_v6 = vadd.f32 %v272_v4, %v271_v5 }
  0x7d   : > { %279 = sbr.rel (%p802_p1) target bundleno = 685 (0x2ad), region = 52 }
  0x7e   : > { %275 = vst [vmem:[#allocation2] sm:$0xff] %v274_v6 }
  0x82   : > { %v294_v7 = vld [vmem:[#allocation8] sm:$0xf]  ;;  %vm370_vm0 = vcmask 257024   ;;  %vm295_vm1 = vcmask 261120   ;;  %v1197_v9 = vmov 0.0   ;;  %vm1198_vm2 = vmmov 0  }
  0x83   : > { %v369_v8 = vmul.f32 %v294_v7, %v294_v7  ;;  %811 = vmatprep.subr.mxu0 %v1197_v9  ;;  %813 = vmatprep.mubr.msk.f32.mxu0 %vm1198_vm2, %v1197_v9  ;;  %v406_v15 = vlaneseq  ;;  %vm431_vm12 = vcmask 27648  }
  0x84   : > { %812 = vmatpush3.xpose.msk.msra.mxu0 %vm295_vm1, %v294_v7 }
  0x85   : > { %v371_v10 = vsel %vm370_vm0, %v369_v8, 0.0  ;;  %v280_v12 = vld [vmem:[#allocation2] sm:$0xff]  ;;  %v407_v16 = vshrl.u32 %v406_v15, 7  ;;  %v416_v25 = vand.u32 127, %v406_v15 }
  0x86   : > { %372 = vadd.xlane.f32.xlu0 %v371_v10  ;;  %281 = vadd.xlane.f32.xlu1 %v280_v12 }
  0x87   : > { %814 = vmatmul.mubr.msk.f32.vlgmr.msra.gmra.mxu0 %vm295_vm1, %v294_v7  ;;  %v408_v17 = vsub.s32 0, %v407_v16  ;;  %vm417_vm3 = vcmp.lt.s32.totalorder %v407_v16, 2  ;;  %vm418_vm4 = vcmp.lt.s32.totalorder %v416_v25, 2  ;;  %vm420_vm5 = vcmp.ge.s32.totalorder %v407_v16, 2 }
  0x88   : > { %vm421_vm6 = vcmp.ge.s32.totalorder %v416_v25, 2  ;;  %vm419_vm7 = vmand %vm417_vm3, %vm418_vm4  ;;  %vm424_vm10 = vcmp.ne.s32.totalorder %v407_v16, %v416_v25 }
  0x89   : > { %vm422_vm8 = vmand %vm420_vm5, %vm421_vm6 }
  0x8a   : > { %vm423_vm9 = vmor %vm419_vm7, %vm422_vm8 }
  0x8b   : > { %vm1403_vm11 = vmand %vm423_vm9, %vm424_vm10 }
  0x8c   : > { %vm1414_vm13 = vmand %vm417_vm3, %vm421_vm6 }
 0x10f   : > { %v373_v11 = vpop.xlane.xlu0 %372  ;;  %v282_v39 = vpop.xlane.xlu1 %281 }
 0x110   : > { %374 = vxpose.xlu0.b32.start.end [1/1] (short) (narrow) %v373_v11, 8  ;;  %v283_v43 = vrot.slane %v282_v39, 4 }
 0x112   : > { %v284_v48 = vadd.f32 %v283_v43, %v282_v39 }
 0x114   : > { %v285_v52 = vrot.slane %v284_v48, 2 }
 0x116   : > { %v286_v57 = vadd.f32 %v285_v52, %v284_v48 }
 0x118   : > { %v287_v59 = vrot.slane %v286_v57, 1 }
 0x11a   : > { %v288_v62 = vadd.f32 %v287_v59, %v286_v57 }
 0x11c   : > { %816 = vpush %v288_v62 }
 0x147   : > { %v365_v13 = vpop.f32.mrf.mxu0 }
 0x148   : > { %v411_v20 = vmul.f32 2.0, %v365_v13 }
 0x149   : > { %v815_v14 = vpop.f32.mrf.mxu0 }
 0x14d   : > { %s1459_s26 = spop %816 }
 0x18c   : > { %v390_v18 = vpop.trf.xlu0 }
 0x18d   : > { %v409_v19 = vrot.slane %v390_v18, %v408_v17 }
 0x18f   : > { %v410_v21 = vadd.f32 %v409_v19, %v373_v11 }
 0x191   : > { %v412_v22 = vsub.f32 %v410_v21, %v411_v20 }
 0x193   : > { %v614_v23 = vadd.f32 640.0, %v412_v22  ;;  %v427_v24 = vadd.f32 6.4, %v412_v22  ;;  %v459_v26 = vadd.f32 12.8, %v412_v22  ;;  %v490_v27 = vadd.f32 32.0, %v412_v22 }
 0x194   : > { %v521_v33 = vadd.f32 64.0, %v412_v22  ;;  %v552_v46 = vadd.f32 128.0, %v412_v22  ;;  %v583_v55 = vadd.f32 320.0, %v412_v22 }
 0x195   : > { %967 = vrcp.f32 %v614_v23 }
 0x196   : > { %969 = vrcp.f32 %v427_v24 }
 0x197   : > { %971 = vrcp.f32 %v459_v26 }
 0x198   : > { %973 = vrcp.f32 %v490_v27 }
 0x199   : > { %975 = vrcp.f32 %v521_v33 }
 0x19a   : > { %977 = vrcp.f32 %v552_v46 }
 0x19b   : > { %979 = vrcp.f32 %v583_v55 }
 0x1a2   : > { %v968_v28 = vpop.eup %967 }
 0x1a3   : > { %v970_v30 = vpop.eup %969  ;;  %v1407_v31 = vmul.f32 640.0, %v968_v28 }
 0x1a4   : > { %v429_v32 = vmul.f32 6.4, %v970_v30  ;;  %v972_v34 = vpop.eup %971 }
 0x1a5   : > { %v617_v35 = vsel %vm1403_vm11, %v1407_v31, 0.0  ;;  %v461_v42 = vmul.f32 12.8, %v972_v34  ;;  %v974_v47 = vpop.eup %973  ;;  %v628_v16 = vsel %vm1414_vm13, %v1407_v31, 0.0 }
 0x1a6   : > { %v618_v37 = vsel %vm431_vm12, %v617_v35, 0.0  ;;  %v430_v38 = vsel %vm1403_vm11, %v429_v32, 0.0  ;;  %v442_v41 = vsel %vm1414_vm13, %v429_v32, 0.0  ;;  %v492_v51 = vmul.f32 32.0, %v974_v47  ;;  %v976_v56 = vpop.eup %975 }
 0x1a7   : > { %619 = vadd.xlane.f32.xlu0 %v618_v37  ;;  %v432_v40 = vsel %vm431_vm12, %v430_v38, 0.0  ;;  %v443_v44 = vsel %vm431_vm12, %v442_v41, 0.0  ;;  %v462_v45 = vsel %vm1403_vm11, %v461_v42, 0.0  ;;  %v473_v50 = vsel %vm1414_vm13, %v461_v42, 0.0  ;;  %v978_v1 = vpop.eup %977 }
 0x1a8   : > { %433 = vadd.xlane.f32.xlu1 %v432_v40  ;;  %v463_v49 = vsel %vm431_vm12, %v462_v45, 0.0  ;;  %v474_v53 = vsel %vm431_vm12, %v473_v50, 0.0  ;;  %v493_v54 = vsel %vm1403_vm11, %v492_v51, 0.0  ;;  %v504_v60 = vsel %vm1414_vm13, %v492_v51, 0.0  ;;  %v980_v7 = vpop.eup %979 }
 0x1a9   : > { %v494_v58 = vsel %vm431_vm12, %v493_v54, 0.0  ;;  %v523_v61 = vmul.f32 64.0, %v976_v56  ;;  %v505_v63 = vsel %vm431_vm12, %v504_v60, 0.0  ;;  %v554_v4 = vmul.f32 128.0, %v978_v1 }
 0x1aa   : > { %v585_v10 = vmul.f32 320.0, %v980_v7  ;;  %v629_v17 = vsel %vm431_vm12, %v628_v16, 0.0 }
 0x1ab   : > { %v524_v0 = vsel %vm1403_vm11, %v523_v61, 0.0  ;;  %v535_v3 = vsel %vm1414_vm13, %v523_v61, 0.0  ;;  %v555_v6 = vsel %vm1403_vm11, %v554_v4, 0.0  ;;  %v566_v9 = vsel %vm1414_vm13, %v554_v4, 0.0 }
 0x1ac   : > { %444 = vadd.xlane.f32.xlu1 %v443_v44  ;;  %v525_v2 = vsel %vm431_vm12, %v524_v0, 0.0  ;;  %v536_v5 = vsel %vm431_vm12, %v535_v3, 0.0  ;;  %v556_v8 = vsel %vm431_vm12, %v555_v6, 0.0  ;;  %v567_v11 = vsel %vm431_vm12, %v566_v9, 0.0 }
 0x1ad   : > { %v586_v12 = vsel %vm1403_vm11, %v585_v10, 0.0  ;;  %v597_v14 = vsel %vm1414_vm13, %v585_v10, 0.0 }
 0x1ae   : > { %v587_v13 = vsel %vm431_vm12, %v586_v12, 0.0  ;;  %v598_v15 = vsel %vm431_vm12, %v597_v14, 0.0 }
 0x1b0   : > { %464 = vadd.xlane.f32.xlu1 %v463_v49 }
 0x1b4   : > { %475 = vadd.xlane.f32.xlu1 %v474_v53 }
 0x1b8   : > { %495 = vadd.xlane.f32.xlu1 %v494_v58 }
 0x1bc   : > { %506 = vadd.xlane.f32.xlu1 %v505_v63 }
 0x1c0   : > { %526 = vadd.xlane.f32.xlu1 %v525_v2 }
 0x1c4   : > { %537 = vadd.xlane.f32.xlu1 %v536_v5 }
 0x1c8   : > { %557 = vadd.xlane.f32.xlu1 %v556_v8 }
 0x1cc   : > { %568 = vadd.xlane.f32.xlu1 %v567_v11 }
 0x1d0   : > { %588 = vadd.xlane.f32.xlu1 %v587_v13 }
 0x1d4   : > { %599 = vadd.xlane.f32.xlu1 %v598_v15 }
 0x1d8   : > { %630 = vadd.xlane.f32.xlu1 %v629_v17 }
 0x230   : > { %v620_v5 = vpop.xlane.xlu0 %619 }
 0x231   : > { %v434_v18 = vpop.xlane.xlu1 %433  ;;  %v621_v12 = vrot.slane %v620_v5, 4 }
 0x232   : > { %v435_v19 = vrot.slane %v434_v18, 4 }
 0x234   : > { %v436_v20 = vadd.f32 %v435_v19, %v434_v18 }
 0x235   : > { %v445_v21 = vpop.xlane.xlu1 %444 }
 0x236   : > { %v437_v22 = vrot.slane %v436_v20, 2  ;;  %v446_v23 = vrot.slane %v445_v21, 4 }
 0x238   : > { %v447_v24 = vadd.f32 %v446_v23, %v445_v21  ;;  %v438_v25 = vadd.f32 %v437_v22, %v436_v20  ;;  %v622_v20 = vadd.f32 %v621_v12, %v620_v5 }
 0x239   : > { %v465_v26 = vpop.xlane.xlu1 %464 }
 0x23a   : > { %v448_v27 = vrot.slane %v447_v24, 2  ;;  %v466_v28 = vrot.slane %v465_v26, 4  ;;  %v439_v29 = vrot.slane %v438_v25, 1 }
 0x23c   : > { %v467_v30 = vadd.f32 %v466_v28, %v465_v26  ;;  %v440_v32 = vadd.f32 %v439_v29, %v438_v25  ;;  %v449_v33 = vadd.f32 %v448_v27, %v447_v24  ;;  %v623_v28 = vrot.slane %v622_v20, 2 }
 0x23d   : > { %v476_v34 = vpop.xlane.xlu1 %475 }
 0x23e   : > { %v468_v31 = vrot.slane %v467_v30, 2  ;;  %v477_v35 = vrot.slane %v476_v34, 4  ;;  %818 = vpush %v440_v32  ;;  %v450_v36 = vrot.slane %v449_v33, 1 }
 0x240   : > { %v478_v37 = vadd.f32 %v477_v35, %v476_v34  ;;  %v451_v38 = vadd.f32 %v450_v36, %v449_v33  ;;  %v469_v39 = vadd.f32 %v468_v31, %v467_v30  ;;  %v624_v36 = vadd.f32 %v623_v28, %v622_v20 }
 0x241   : > { %v496_v40 = vpop.xlane.xlu1 %495 }
 0x242   : > { %v479_v41 = vrot.slane %v478_v37, 2  ;;  %v497_v42 = vrot.slane %v496_v40, 4  ;;  %820 = vpush %v451_v38  ;;  %v470_v43 = vrot.slane %v469_v39, 1 }
 0x244   : > { %v498_v44 = vadd.f32 %v497_v42, %v496_v40  ;;  %v471_v45 = vadd.f32 %v470_v43, %v469_v39  ;;  %v480_v46 = vadd.f32 %v479_v41, %v478_v37 }
 0x245   : > { %v507_v47 = vpop.xlane.xlu1 %506 }
 0x246   : > { %v499_v48 = vrot.slane %v498_v44, 2  ;;  %v508_v49 = vrot.slane %v507_v47, 4  ;;  %822 = vpush %v471_v45  ;;  %v481_v50 = vrot.slane %v480_v46, 1 }
 0x248   : > { %v509_v51 = vadd.f32 %v508_v49, %v507_v47  ;;  %v482_v52 = vadd.f32 %v481_v50, %v480_v46  ;;  %v500_v53 = vadd.f32 %v499_v48, %v498_v44  ;;  %v625_v44 = vrot.slane %v624_v36, 1 }
 0x249   : > { %v527_v54 = vpop.xlane.xlu1 %526 }
 0x24a   : > { %v510_v55 = vrot.slane %v509_v51, 2  ;;  %v528_v56 = vrot.slane %v527_v54, 4  ;;  %824 = vpush %v482_v52  ;;  %v501_v57 = vrot.slane %v500_v53, 1  ;;  %v626_v49 = vadd.f32 %v625_v44, %v624_v36 }
 0x24c   : > { %v529_v58 = vadd.f32 %v528_v56, %v527_v54  ;;  %v502_v59 = vadd.f32 %v501_v57, %v500_v53  ;;  %v511_v60 = vadd.f32 %v510_v55, %v509_v51 }
 0x24d   : > { %v538_v61 = vpop.xlane.xlu1 %537 }
 0x24e   : > { %v530_v62 = vrot.slane %v529_v58, 2  ;;  %v539_v63 = vrot.slane %v538_v61, 4  ;;  %826 = vpush %v502_v59  ;;  %v512_v0 = vrot.slane %v511_v60, 1 }
 0x250   : > { %v540_v1 = vadd.f32 %v539_v63, %v538_v61  ;;  %v513_v2 = vadd.f32 %v512_v0, %v511_v60  ;;  %v531_v3 = vadd.f32 %v530_v62, %v529_v58 }
 0x251   : > { %v558_v4 = vpop.xlane.xlu1 %557 }
 0x252   : > { %v541_v6 = vrot.slane %v540_v1, 2  ;;  %v559_v7 = vrot.slane %v558_v4, 4  ;;  %828 = vpush %v513_v2  ;;  %v532_v8 = vrot.slane %v531_v3, 1 }
 0x254   : > { %v560_v9 = vadd.f32 %v559_v7, %v558_v4  ;;  %v533_v10 = vadd.f32 %v532_v8, %v531_v3  ;;  %v542_v11 = vadd.f32 %v541_v6, %v540_v1 }
 0x255   : > { %v569_v13 = vpop.xlane.xlu1 %568 }
 0x256   : > { %v561_v14 = vrot.slane %v560_v9, 2  ;;  %v570_v15 = vrot.slane %v569_v13, 4  ;;  %830 = vpush %v533_v10  ;;  %v543_v16 = vrot.slane %v542_v11, 1 }
 0x258   : > { %v571_v17 = vadd.f32 %v570_v15, %v569_v13  ;;  %v544_v18 = vadd.f32 %v543_v16, %v542_v11  ;;  %v562_v19 = vadd.f32 %v561_v14, %v560_v9 }
 0x259   : > { %v589_v21 = vpop.xlane.xlu1 %588 }
 0x25a   : > { %v572_v22 = vrot.slane %v571_v17, 2  ;;  %v590_v23 = vrot.slane %v589_v21, 4  ;;  %832 = vpush %v544_v18  ;;  %v563_v24 = vrot.slane %v562_v19, 1 }
 0x25c   : > { %v591_v25 = vadd.f32 %v590_v23, %v589_v21  ;;  %v564_v26 = vadd.f32 %v563_v24, %v562_v19  ;;  %v573_v27 = vadd.f32 %v572_v22, %v571_v17 }
 0x25d   : > { %v600_v29 = vpop.xlane.xlu1 %599 }
 0x25e   : > { %v592_v30 = vrot.slane %v591_v25, 2  ;;  %v601_v32 = vrot.slane %v600_v29, 4  ;;  %834 = vpush %v564_v26  ;;  %v574_v33 = vrot.slane %v573_v27, 1 }
 0x260   : > { %v602_v34 = vadd.f32 %v601_v32, %v600_v29  ;;  %v575_v31 = vadd.f32 %v574_v33, %v573_v27  ;;  %v593_v35 = vadd.f32 %v592_v30, %v591_v25 }
 0x261   : > { %v631_v37 = vpop.xlane.xlu1 %630 }
 0x262   : > { %v603_v38 = vrot.slane %v602_v34, 2  ;;  %v632_v39 = vrot.slane %v631_v37, 4  ;;  %836 = vpush %v575_v31  ;;  %v594_v40 = vrot.slane %v593_v35, 1 }
 0x264   : > { %v633_v41 = vadd.f32 %v632_v39, %v631_v37  ;;  %v595_v42 = vadd.f32 %v594_v40, %v593_v35  ;;  %v604_v43 = vadd.f32 %v603_v38, %v602_v34 }
 0x266   : > { %v634_v45 = vrot.slane %v633_v41, 2  ;;  %838 = vpush %v595_v42  ;;  %v605_v46 = vrot.slane %v604_v43, 1 }
 0x268   : > { %v635_v47 = vadd.f32 %v634_v45, %v633_v41  ;;  %v606_v48 = vadd.f32 %v605_v46, %v604_v43 }
 0x26a   : > { %840 = vpush %v606_v48  ;;  %v636_v50 = vrot.slane %v635_v47, 1 }
 0x26b   : > { %842 = vpush %v626_v49 }
 0x26c   : > { %v637_v51 = vadd.f32 %v636_v50, %v635_v47 }
 0x26e   : > { %844 = vpush %v637_v51 }
 0x26f   : > { %s819_s24 = spop %818 }
 0x273   : > { %s821_s8 = spop %820 }
 0x274   : > { %s453_s27 = smul.f32 2.0, %s821_s8 }
 0x276   : > { %s456_s4 = smul.f32 0.5, %s453_s27 }
 0x277   : > { %s823_s6 = spop %822 }
 0x278   : > { %s457_s9 = ssub.f32 %s819_s24, %s456_s4 }
 0x27b   : > { %s825_s7 = spop %824 }
 0x27c   : > { %s484_s18 = smul.f32 2.0, %s825_s7  ;;  %s1575_s7 = sld [smem:[#allocation19_spill]] }
 0x27e   : > { %s487_s15 = smul.f32 0.5, %s484_s18 }
 0x27f   : > { %s827_s19 = spop %826 }
 0x280   : > { %s488_s1 = ssub.f32 %s823_s6, %s487_s15 }
 0x282   : > { %s489_s17 = sadd.f32 %s488_s1, %s457_s9  ;;  %p645_p3 = scmp.eq.s32.totalorder %s1575_s7, 0 }
 0x283   : > { %s829_s3 = spop %828 }
 0x284   : > { %s515_s11 = smul.f32 2.0, %s829_s3 }
 0x286   : > { %s518_s30 = smul.f32 0.5, %s515_s11 }
 0x287   : > { %s831_s10 = spop %830 }
 0x288   : > { %s519_s21 = ssub.f32 %s827_s19, %s518_s30  ;;  %s290_s30 = smul.f32 0.05, %s1459_s26 }
 0x28a   : > { %s520_s3 = sadd.f32 %s519_s21, %s489_s17 }
 0x28b   : > { %s833_s12 = spop %832 }
 0x28c   : > { %s546_s23 = smul.f32 2.0, %s833_s12 }
 0x28e   : > { %s549_s5 = smul.f32 0.5, %s546_s23 }
 0x28f   : > { %s835_s28 = spop %834 }
 0x290   : > { %s550_s16 = ssub.f32 %s831_s10, %s549_s5  ;;  %s293_s5 = smul.f32 0.5, %s290_s30 }
 0x292   : > { %s551_s12 = sadd.f32 %s550_s16, %s520_s3 }
 0x293   : > { %s837_s29 = spop %836 }
 0x294   : > { %s577_s0 = smul.f32 2.0, %s837_s29 }
 0x296   : > { %s580_s20 = smul.f32 0.5, %s577_s0 }
 0x297   : > { %s839_s8 = spop %838 }
 0x298   : > { %s581_s27 = ssub.f32 %s835_s28, %s580_s20 }
 0x29a   : > { %s582_s24 = sadd.f32 %s581_s27, %s551_s12 }
 0x29b   : > { %s841_s2 = spop %840 }
 0x29c   : > { %s608_s14 = smul.f32 2.0, %s841_s2  ;;  %s843_s22 = spop %842 }
 0x29d   : > { %s1576_s2 = scalar_lea.vmem [#allocation9], %s1396_s25 }
 0x29e   : > { %s611_s18 = smul.f32 0.5, %s608_s14 }
 0x29f   : > { %s845_s11 = spop %844 }
 0x2a0   : > { %s612_s29 = ssub.f32 %s839_s8, %s611_s18  ;;  %s639_s6 = smul.f32 2.0, %s845_s11 }
 0x2a2   : > { %s642_s4 = smul.f32 0.5, %s639_s6  ;;  %s613_s0 = sadd.f32 %s612_s29, %s582_s24 }
 0x2a4   : > { %s643_s19 = ssub.f32 %s843_s22, %s642_s4 }
 0x2a6   : > { %s644_s1 = sadd.f32 %s643_s19, %s613_s0 }
 0x2a8   : > { %s1604_s1 = smov (!%p645_p3, %s644_s1), 0.0 }
 0x2a9   : > { %s647_s9 = sadd.f32 %s1604_s1, %s293_s5 }
 0x2ab   : > { %v648_v52 = vstv %s647_s9 }
 0x2ac   : > { %649 = vst [vmem:[%s1576_s2] sm:$0xff] %v648_v52 }
 0x2ad PF: > { %s1577_s14 = sld [smem:[#allocation19_spill]]  ;;  %s1580_s15 = scalar_lea.vmem [#allocation9], %s1396_s25 }
 0x2ae   : > { %s1579_s10 = sld [smem:[#allocation32_spill]]  ;;  %s664_s22 = sshll.u32 %s1580_s15, 4  ;;  %s665_s22 = int_to_ptr.vmem [resolvable:$true] %s664_s22 }
 0x2af   : > { %s1581_s28 = sand.u32 1, %s1155_s13   ;;  %s1063_s8 = scalar_lea.vmem %s665_s22, 128 }
 0x2b0   : > { %s651_s23 = scalar_lea.sflag [#allocation5], %s1581_s28  ;;  %p1064_p8 = scmp.ne.s32.totalorder %s665_s22, %s1063_s8 }
 0x2b1   : > { %s1199_s7 = smov [#allocation9]  }
 0x2b2   : > { %p1065_p10 = pnand %p1064_p8, %p1291_p7  ;;  %s1067_s3 = sshll.u32 %s1199_s7, 4  ;;  %s1068_s3 = int_to_ptr.vmem [resolvable:$false] %s1067_s3 }
 0x2b3   : > { %s806_s17 = sshll.u32 %s1577_s14, 7  ;;  %s1069_s27 = scalar_lea.vmem %s1068_s3, 256 }
 0x2b4   : > { %s662_s26 = scalar_lea.hbm %s1579_s10, %s806_s17  ;;  %p1066_p5 = pneg %p1065_p10 }
 0x2b5   : > { %p1070_p6 = scmp.lt.s32.totalorder %s665_s22, %s1068_s3  ;;  %p1071_p12 = scmp.lt.s32.totalorder %s1069_s27, %s1063_s8 }
 0x2b7   : > { %p1072_p9 = por %p1071_p12, %p1070_p6 }
 0x2b9   : > { %p1073_p0 = pnand %p1072_p9, %p1066_p5 }
 0x2bb   : > { %1076 = shalt.err (!%p1073_p0)
}
 0x2bc   : > { %s1077_s18 = scalar_lea.hbm %s662_s26, 128  ;;  %s1081_s11 = scalar_lea.hbm %s1579_s10, 256 }
 0x2bd   : > { %p1078_p2 = scmp.ne.s32.totalorder %s662_s26, %s1077_s18  ;;  %p1082_p11 = scmp.lt.s32.totalorder %s662_s26, %s1579_s10 }
 0x2be   : > { %p1083_p1 = scmp.lt.s32.totalorder %s1081_s11, %s1077_s18 }
 0x2bf   : > { %p1079_p4 = pnand %p1078_p2, %p1291_p7 }
 0x2c0   : > { %p1084_p3 = por %p1083_p1, %p1082_p11 }
 0x2c1   : > { %p1080_p13 = pneg %p1079_p4 }
 0x2c3   : > { %p1085_p8 = pnand %p1084_p3, %p1080_p13 }
 0x2c5   : > { %1088 = shalt.err (!%p1085_p8)
}
 0x2c6   : > { %854 = dma.vmem_to_hbm [thread:$0]  (%p1291_p7), %s665_s22, 128, %s662_s26, %s651_s23  }
 0x2c7 PF: > { %s1582_s24 = sld [smem:[#allocation22_spill]] }
 0x2c8   : > { %s1583_s4 = sld [smem:[#allocation14_spill]] }
 0x2c9   : > { %s1584_s30 = sld [smem:[#allocation24_spill]] }
 0x2cd   : > { %p874_p10 = scmp.ge.s32.totalorder %s1582_s24, 2 }
 0x2ce   : > { %s676_s0 = sand.u32 1, %s1583_s4  }
 0x2cf   : > { %p1585_p5 = scmp.ne.s32.totalorder %s1584_s30, 0  ;;  %s677_s19 = scalar_lea.sflag [#allocation5], %s676_s0 }
 0x2d1   : > { %p868_p6 = pnand %p874_p10, %p1585_p5 }
 0x2d3   : > { %p869_p12 = pneg %p868_p6 }
 0x2d5   : > { %1146 = dma.done.wait (%p869_p12), %s677_s19, 128  }
 0x2d6   : > { %1148 = vsyncadd (%p869_p12), %s677_s19, 4294967168  ;;  %s22_s22 = sadd.s32 1, %s1582_s24   ;;  %s1586_s1 = sld [smem:[#allocation15_spill]] }
 0x2d7   : > { %p19_p9 = scmp.ge.s32.totalorder %s22_s22, 10   ;;  %s1587_s14 = sld [smem:[#allocation27_spill]] }
 0x2d8   : > { %s1588_s15 = sld [smem:[#allocation16_spill]]  ;;  %s1595_s12 = smov %s1155_s13 }
 0x2d9   : > { %s1589_s16 = sld [smem:[#allocation17_spill]] }
 0x2da   : > { %s1590_s17 = sld [smem:[#allocation28_spill]]  ;;  %21 = sbr.rel (!%p19_p9) target bundleno = 16 (0x10), region = 102 }
 0x2db   : > { %s1591_s18 = sld [smem:[#allocation20_spill]] }
 0x2dc   : > { %s1592_s19 = sld [smem:[#allocation21_spill]]  ;;  %s1596_s13 = smov %s1586_s1 }
 0x2dd   : > { %s1593_s20 = sld [smem:[#allocation25_spill]] }
 0x2de   : > { %s1594_s21 = sld [smem:[#allocation26_spill]] }
 0x2df   :  { %682 = vsyncpa [#allocation4], 1 }
 0x2e0   :  { %684 = vsyncpa [#allocation4 + $0x1], 1 }
 0x2e1   :  { %685 = vsyncpa [#allocation7], 1 }
 0x2e2   :  { %687 = vsyncpa [#allocation7 + $0x1], 1 }
 0x2e3   :  { %688 = vsyncpa [#allocation5], 1 }
 0x2e4   :  { %690 = vsyncpa [#allocation5 + $0x1], 1 }

</bundles_post_ra>
